<compile_context>
chip_gen: v7x
topology: tpu7x:2x2x1
jax: 0.10.0
libtpu: 0.0.40
codegen_flags: <defaults>
</compile_context>

<pallas_src>
import functools

import jax
import jax.numpy as jnp
from jax.experimental import pallas as pl
from jax.experimental.pallas import tpu as pltpu


# ----------------------------------------------------------------------------
# Pallas kernel: fused ToTensor + Normalize  ->  y = x * scale + offset
# ----------------------------------------------------------------------------
def _normalize_kernel(x_ref, scale_ref, offset_ref, o_ref):
    # x_ref:      (row_tile, L) raw uint8 pixels in [0, 255]
    # scale_ref:  (1, L)        folded 1/(255*std[c]) laid out per lane
    # offset_ref: (1, L)        folded -mean[c]/std[c] laid out per lane
    # o_ref:      (row_tile, L) float32 output
    x = x_ref[...].astype(jnp.int32).astype(jnp.float32)   # u8 -> i32 -> f32
    o_ref[...] = x * scale_ref[...] + offset_ref[...]


@functools.partial(jax.jit, static_argnames=("row_tile",))
def _normalize_rows(x2d, scale_row, offset_row, row_tile):
    """Normalize a (R, L) uint8 array of flattened images -> (R, L) float32."""
    R, L = x2d.shape
    n_tiles = pl.cdiv(R, row_tile)
    Rp = n_tiles * row_tile
    if Rp != R:                      # pad rows so every block is full-size
        x2d = jnp.pad(x2d, ((0, Rp - R), (0, 0)))

    out = pl.pallas_call(
        _normalize_kernel,
        out_shape=jax.ShapeDtypeStruct((Rp, L), jnp.float32),
        grid_spec=pltpu.PrefetchScalarGridSpec(
            num_scalar_prefetch=0,
            grid=(n_tiles,),
            in_specs=[
                pl.BlockSpec((row_tile, L), lambda i: (i, 0)),
                pl.BlockSpec((1, L), lambda i: (0, 0)),
                pl.BlockSpec((1, L), lambda i: (0, 0)),
            ],
            out_specs=pl.BlockSpec((row_tile, L), lambda i: (i, 0)),
        ),
        compiler_params=pltpu.CompilerParams(
            dimension_semantics=("parallel",),
        ),
    )(x2d, scale_row, offset_row)
    return out[:R]


def normalize_images(x_nchw, mean, std, max_row_tile=256):
    """ToTensor (/255) + Normalize(mean, std) per channel via one Pallas call.

    x_nchw: (N, C, H, W) uint8 (or any integer/float) raw pixel values.
    Returns float32 (N, C, H, W).
    """
    N, C, H, W = x_nchw.shape
    L = C * H * W

    mean = jnp.asarray(mean, jnp.float32).reshape(C)
    std = jnp.asarray(std, jnp.float32).reshape(C)
    scale = 1.0 / (255.0 * std)          # fold /255 and 1/std into one mul
    offset = -mean / std                 # fold -mean/std into one add
    scale_row = jnp.repeat(scale, H * W).reshape(1, L)    # lane-dense rows
    offset_row = jnp.repeat(offset, H * W).reshape(1, L)

    x2d = x_nchw.reshape(N, L)           # keep the narrow source dtype

    # row_tile: big enough to amortize per-step overhead, multiple of 32 so
    # uint8 sublane packing stays aligned, capped so tiny inputs pad little.
    row_tile = int(min(max_row_tile, ((N + 31) // 32) * 32))

    out2d = _normalize_rows(x2d, scale_row, offset_row, row_tile)
    return out2d.reshape(N, C, H, W)


# ----------------------------------------------------------------------------
# MakeDataset.forward() equivalent
# ----------------------------------------------------------------------------
def make_dataset(train_images, train_labels, test_images, test_labels,
                 batch_size, key):
    """Mirror of MakeDataset.forward().

    Returns (train_batches, val_batches, test_batches, num_of_class,
    class_index_map); *_batches are lists of (images, labels) tuples (the
    stand-in for DataLoader iterators).
    """
    # --- DataPreprocess(): normalize train + test in ONE fused kernel launch
    C = train_images.shape[1]
    mean = jnp.full((C,), 0.5, dtype=jnp.float32)
    std = jnp.full((C,), 0.5, dtype=jnp.float32)

    n_train = train_images.shape[0]
    all_images = jnp.concatenate([train_images, test_images], axis=0)
    all_norm = normalize_images(all_images, mean, std)
    train_norm = all_norm[:n_train]
    test_norm = all_norm[n_train:]

    num_of_class = int(jnp.max(train_labels)) + 1
    class_index_map = {f"class_{i}": i for i in range(num_of_class)}

    # --- random_split(dataset=train_data, lengths=[16, 4]) ---
    key, k_split, k_train, k_val = jax.random.split(key, 4)
    perm = jax.random.permutation(k_split, train_norm.shape[0])
    train_idx, val_idx = perm[:16], perm[16:20]

    # --- DataLoader(shuffle=True) for train / val, shuffle=False for test ---
    # TODO(synk): DataLoader is a host-side iterator abstraction with no
    # Pallas equivalent; here it is represented as pre-batched array lists.
    def batchify(images, labels, idx, bs, shuffle_key=None):
        if shuffle_key is not None:
            idx = idx[jax.random.permutation(shuffle_key, idx.shape[0])]
        imgs, labs = images[idx], labels[idx]
        n_full = (idx.shape[0] // bs) * bs
        batches = []
        for s in range(0, n_full, bs):
            batches.append((imgs[s:s + bs], labs[s:s + bs]))
        if n_full < idx.shape[0]:
            batches.append((imgs[n_full:], labs[n_full:]))
        return batches

    train_dataset = batchify(train_norm, train_labels, train_idx,
                             batch_size, shuffle_key=k_train)
    val_dataset = batchify(train_norm, train_labels, val_idx,
                           batch_size, shuffle_key=k_val)
    test_idx = jnp.arange(test_norm.shape[0])
    test_dataset = batchify(test_norm, test_labels, test_idx, batch_size)

    return train_dataset, val_dataset, test_dataset, num_of_class, class_index_map


# ----------------------------------------------------------------------------
# main
# ----------------------------------------------------------------------------
if __name__ == "__main__":
    key = jax.random.PRNGKey(0)
    k_tr_img, k_tr_lab, k_te_img, k_te_lab, k_ds = jax.random.split(key, 5)

    N_TRAIN, N_TEST = 20, 8          # 20 -> random_split([16, 4])
    C, H, W = 4, 16, 16              # small NCHW images
    BATCH_SIZE = 4
    NUM_CLASSES = 4

    # raw uint8 pixel data (what an image decoder yields)
    train_images = jax.random.randint(
        k_tr_img, (N_TRAIN, C, H, W), 0, 256, dtype=jnp.int32).astype(jnp.uint8)
    train_labels = jax.random.randint(k_tr_lab, (N_TRAIN,), 0, NUM_CLASSES)
    test_images = jax.random.randint(
        k_te_img, (N_TEST, C, H, W), 0, 256, dtype=jnp.int32).astype(jnp.uint8)
    test_labels = jax.random.randint(k_te_lab, (N_TEST,), 0, NUM_CLASSES)

    (train_ds, val_ds, test_ds,
     num_of_class, class_index_map) = make_dataset(
        train_images, train_labels, test_images, test_labels,
        batch_size=BATCH_SIZE, key=k_ds)

    # block on every kernel-produced batch
    for batches in (train_ds, val_ds, test_ds):
        for imgs, labs in batches:
            jax.block_until_ready(imgs)
            jax.block_until_ready(labs)

    # sanity check against pure-JAX reference of the normalize transform
    ref = (train_images.astype(jnp.float32) / 255.0 - 0.5) / 0.5
    got = normalize_images(train_images,
                           jnp.full((C,), 0.5), jnp.full((C,), 0.5))
    got = jax.block_until_ready(got)
    assert got.dtype == jnp.float32
    assert jnp.allclose(got, ref, atol=1e-5)
    assert num_of_class == NUM_CLASSES
    assert len(class_index_map) == NUM_CLASSES
    assert len(train_ds) == 16 // BATCH_SIZE
    assert len(val_ds) == 1

    print("KERNEL_OK")
</pallas_src>

<mosaic_0001>
module attributes {stable_mosaic.version = 11 : i64} {
  func.func @_normalize_kernel(%arg0: i32, %arg1: memref<32x1024xi8, #tpu.memory_space<vmem>>, %arg2: memref<1x1024xf32, #tpu.memory_space<vmem>>, %arg3: memref<1x1024xf32, #tpu.memory_space<vmem>>, %arg4: memref<32x1024xf32, #tpu.memory_space<vmem>>) attributes {dimension_semantics = [#tpu.dimension_semantics<parallel>], iteration_bounds = array<i64: 1>, scalar_prefetch = 0 : i64, scratch_operands = 0 : i64, tpu.core_type = #tpu.core_type<tc>, window_params = [{transform_indices = @transform_0, window_bounds = array<i64: 32, 1024>}, {pipeline_mode = #tpu.pipeline_mode<synchronous>, transform_indices = @transform_1, window_bounds = array<i64: 1, 1024>}, {pipeline_mode = #tpu.pipeline_mode<synchronous>, transform_indices = @transform_2, window_bounds = array<i64: 1, 1024>}, {transform_indices = @transform_3, window_bounds = array<i64: 32, 1024>}]} {
    %c0 = arith.constant 0 : index
    %c0_0 = arith.constant 0 : index
    %0 = vector.load %arg1[%c0, %c0_0] : memref<32x1024xi8, #tpu.memory_space<vmem>>, vector<32x1024xi8>
    %1 = arith.extui %0 : vector<32x1024xi8> to vector<32x1024xi32>
    %2 = arith.sitofp %1 : vector<32x1024xi32> to vector<32x1024xf32>
    %c0_1 = arith.constant 0 : index
    %c0_2 = arith.constant 0 : index
    %3 = vector.load %arg2[%c0_1, %c0_2] : memref<1x1024xf32, #tpu.memory_space<vmem>>, vector<1x1024xf32>
    %4 = vector.broadcast %3 : vector<1x1024xf32> to vector<32x1024xf32>
    %5 = arith.mulf %2, %4 : vector<32x1024xf32>
    %c0_3 = arith.constant 0 : index
    %c0_4 = arith.constant 0 : index
    %6 = vector.load %arg3[%c0_3, %c0_4] : memref<1x1024xf32, #tpu.memory_space<vmem>>, vector<1x1024xf32>
    %7 = vector.broadcast %6 : vector<1x1024xf32> to vector<32x1024xf32>
    %8 = arith.addf %5, %7 : vector<32x1024xf32>
    %c0_5 = arith.constant 0 : index
    %c0_6 = arith.constant 0 : index
    %9 = vector.load %arg4[%c0_5, %c0_6] : memref<32x1024xf32, #tpu.memory_space<vmem>>, vector<32x1024xf32>
    tpu.vector_store %arg4[%c0_5, %c0_6], %8 {strides = array<i32>} : memref<32x1024xf32, #tpu.memory_space<vmem>>, vector<32x1024xf32>,
    return
  }
  func.func @transform_0(%arg0: i32) -> (i32, i32) {
    %c0_i32 = arith.constant 0 : i32
    %c0_i32_0 = arith.constant 0 : i32
    return %arg0, %c0_i32 : i32, i32
  }
  func.func @transform_1(%arg0: i32) -> (i32, i32) {
    %c0_i32 = arith.constant 0 : i32
    %c0_i32_0 = arith.constant 0 : i32
    %c0_i32_1 = arith.constant 0 : i32
    return %c0_i32, %c0_i32_0 : i32, i32
  }
  func.func @transform_2(%arg0: i32) -> (i32, i32) {
    %c0_i32 = arith.constant 0 : i32
    %c0_i32_0 = arith.constant 0 : i32
    %c0_i32_1 = arith.constant 0 : i32
    return %c0_i32, %c0_i32_0 : i32, i32
  }
  func.func @transform_3(%arg0: i32) -> (i32, i32) {
    %c0_i32 = arith.constant 0 : i32
    %c0_i32_0 = arith.constant 0 : i32
    return %arg0, %c0_i32 : i32, i32
  }
}

</mosaic_0001>

<bundles_post_ra>
// kernel: _normalize_rows.1
= control target key start
LH: loop header
LB: loop body
LE: loop exit
PB: predicated region body
PF: predicated region fallthrough
CT: control target
= control target key end

     0   :  { %v121_v1 = vlaneseq  ;;  %s567_s0 = inlined_call_operand.vmem [shape: u8[32,1024], index: 0, kind: input, shape index: {}]   ;;  %s568_s1 = inlined_call_operand.vmem [shape: f32[1,1024], index: 1, kind: input, shape index: {}]   ;;  %s569_s2 = inlined_call_operand.vmem [shape: f32[1,1024], index: 2, kind: input, shape index: {}]   ;;  %s570_s3 = inlined_call_operand.hbm [shape: f32[32,1024], index: 3, kind: output, shape index: {}]  }
   0x1   :  { %v368_v0 = vld [vmem:[%s567_s0] sm:$0xff]  ;;  %v374_v3 = vld [vmem:[%s567_s0 + $0x8] sm:$0xff]  ;;  %v379_v4 = vld [vmem:[%s567_s0 + $0x10] sm:$0xff] }
   0x2   :  { %v23_v2 = vunpack.c.0.s8 %v368_v0  ;;  %v384_v5 = vld [vmem:[%s567_s0 + $0x18] sm:$0xff]  ;;  %v31_v6 = vunpack.c.1.s8 %v368_v0  ;;  %v39_v7 = vunpack.c.2.s8 %v368_v0  ;;  %v47_v8 = vunpack.c.3.s8 %v368_v0  ;;  %v397_v13 = vld [vmem:[%s567_s0 + $0x20] sm:$0xff]  ;;  %v402_v14 = vld [vmem:[%s567_s0 + $0x28] sm:$0xff] }
   0x3   :  { %v389_v9 = vshrl.u32 %v121_v1, 7  ;;  %v24_v10 = vunpack.c.0.s8 %v374_v3  ;;  %v25_v11 = vunpack.c.0.s8 %v379_v4  ;;  %v26_v12 = vunpack.c.0.s8 %v384_v5  ;;  %v407_v15 = vld [vmem:[%s567_s0 + $0x30] sm:$0xff]  ;;  %v119_v17 = vld [vmem:[%s568_s1] sm:$0xff] }
   0x4   :  { %v55_v16 = vand.u32 255, %v23_v2  ;;  %v193_v18 = vld [vmem:[%s569_s2] sm:$0xff]  ;;  %v27_v19 = vunpack.c.0.s8 %v397_v13  ;;  %v28_v20 = vunpack.c.0.s8 %v402_v14  ;;  %v29_v21 = vunpack.c.0.s8 %v407_v15 }
   0x5   :  { %8 = vsyncpa [#allocation3], 0  ;;  %v123_v22 = vsub.s32 0, %v389_v9  ;;  %v56_v23 = vand.u32 255, %v24_v10  ;;  %v127_v24 = vsub.s32 1, %v389_v9  ;;  %v57_v25 = vand.u32 255, %v25_v11 }
   0x6   :  { %v87_v26 = vcvt.s32.f32 %v55_v16  ;;  %v131_v27 = vsub.s32 2, %v389_v9  ;;  %v58_v28 = vand.u32 255, %v26_v12  ;;  %v135_v29 = vsub.s32 3, %v389_v9  ;;  %v448_v50 = vld [vmem:[%s567_s0 + $0x38] sm:$0xff]  ;;  %s342_s0 = smov [#allocation2]  }
   0x7   :  { %v422_v30 = vrot.slane %v119_v17, %v123_v22  ;;  %v424_v31 = vrot.slane %v193_v18, %v123_v22  ;;  %v88_v32 = vcvt.s32.f32 %v56_v23  ;;  %v426_v33 = vrot.slane %v119_v17, %v127_v24  ;;  %s304_s30 = sshll.u32 %s342_s0, 4  ;;  %s305_s30 = int_to_ptr.vmem [resolvable:$true] %s304_s30 }
   0x8   :  { %v428_v34 = vrot.slane %v193_v18, %v127_v24  ;;  %v89_v35 = vcvt.s32.f32 %v57_v25  ;;  %v430_v36 = vrot.slane %v119_v17, %v131_v27  ;;  %v432_v37 = vrot.slane %v193_v18, %v131_v27  ;;  %s318_s4 = scalar_lea.vmem %s305_s30, 4096  ;;  %p323_p1 = scmp.lt.s32.totalorder %s305_s30, %s305_s30 }
   0x9   :  { %v161_v38 = vmul.f32 %v422_v30, %v87_v26  ;;  %v162_v39 = vmul.f32 %v426_v33, %v88_v32  ;;  %v90_v40 = vcvt.s32.f32 %v58_v28  ;;  %v436_v41 = vrot.slane %v119_v17, %v135_v29  ;;  %p319_p0 = scmp.ne.s32.totalorder %s305_s30, %s318_s4  ;;  %p324_p2 = scmp.lt.s32.totalorder %s318_s4, %s318_s4 }
   0xa   :  { %v163_v42 = vmul.f32 %v430_v36, %v89_v35  ;;  %v439_v43 = vrot.slane %v193_v18, %v135_v29  ;;  %v59_v44 = vand.u32 255, %v27_v19  ;;  %v139_v45 = vsub.s32 4, %v389_v9 }
   0xb   :  { %v235_v46 = vadd.f32 %v424_v31, %v161_v38  ;;  %v236_v47 = vadd.f32 %v428_v34, %v162_v39  ;;  %v164_v48 = vmul.f32 %v436_v41, %v90_v40  ;;  %v60_v49 = vand.u32 255, %v28_v20  ;;  %p325_p3 = por %p324_p2, %p323_p1 }
   0xc   :  { %v237_v51 = vadd.f32 %v432_v37, %v163_v42  ;;  %v91_v52 = vcvt.s32.f32 %v59_v44  ;;  %v451_v53 = vrot.slane %v119_v17, %v139_v45  ;;  %v453_v54 = vrot.slane %v193_v18, %v139_v45 }
   0xd   :  { %267 = vst [vmem:[#allocation2] sm:$0xff] %v235_v46  ;;  %268 = vst [vmem:[#allocation2 + $0x8] sm:$0xff] %v236_v47  ;;  %v238_v55 = vadd.f32 %v439_v43, %v164_v48  ;;  %v92_v56 = vcvt.s32.f32 %v60_v49  ;;  %v143_v57 = vsub.s32 5, %v389_v9  ;;  %v61_v58 = vand.u32 255, %v29_v21  ;;  %p326_p4 = pnand %p325_p3, %p319_p0 }
   0xe   :  { %269 = vst [vmem:[#allocation2 + $0x10] sm:$0xff] %v237_v51  ;;  %v165_v59 = vmul.f32 %v451_v53, %v91_v52  ;;  %v147_v60 = vsub.s32 6, %v389_v9  ;;  %v30_v61 = vunpack.c.0.s8 %v448_v50  ;;  %v151_v62 = vsub.s32 7, %v389_v9 }
   0xf   :  { %270 = vst [vmem:[#allocation2 + $0x18] sm:$0xff] %v238_v55  ;;  %v461_v63 = vrot.slane %v119_v17, %v143_v57  ;;  %v463_v1 = vrot.slane %v193_v18, %v143_v57  ;;  %v93_v2 = vcvt.s32.f32 %v61_v58  ;;  %v63_v10 = vand.u32 255, %v31_v6 }
  0x10   :  { %v239_v11 = vadd.f32 %v453_v54, %v165_v59  ;;  %v468_v12 = vrot.slane %v119_v17, %v147_v60  ;;  %v470_v16 = vrot.slane %v193_v18, %v147_v60  ;;  %v62_v19 = vand.u32 255, %v30_v61 }
  0x11   :  { %v166_v20 = vmul.f32 %v461_v63, %v92_v56  ;;  %v473_v21 = vrot.slane %v119_v17, %v151_v62  ;;  %v475_v9 = vrot.slane %v193_v18, %v151_v62  ;;  %v95_v22 = vcvt.s32.f32 %v63_v10 }
  0x12   :  { %271 = vst [vmem:[#allocation2 + $0x20] sm:$0xff] %v239_v11  ;;  %v167_v23 = vmul.f32 %v468_v12, %v93_v2  ;;  %v94_v24 = vcvt.s32.f32 %v62_v19  ;;  %v32_v6 = vunpack.c.1.s8 %v374_v3  ;;  %v33_v25 = vunpack.c.1.s8 %v379_v4 }
  0x13   :  { %v240_v26 = vadd.f32 %v463_v1, %v166_v20  ;;  %v169_v27 = vmul.f32 %v422_v30, %v95_v22  ;;  %v34_v28 = vunpack.c.1.s8 %v384_v5  ;;  %v35_v17 = vunpack.c.1.s8 %v397_v13 }
  0x14   :  { %v241_v18 = vadd.f32 %v470_v16, %v167_v23  ;;  %v168_v29 = vmul.f32 %v473_v21, %v94_v24  ;;  %v64_v32 = vand.u32 255, %v32_v6  ;;  %v65_v35 = vand.u32 255, %v33_v25 }
  0x15   :  { %272 = vst [vmem:[#allocation2 + $0x28] sm:$0xff] %v240_v26  ;;  %v243_v38 = vadd.f32 %v424_v31, %v169_v27  ;;  %v66_v39 = vand.u32 255, %v34_v28  ;;  %v67_v40 = vand.u32 255, %v35_v17  ;;  %v36_v42 = vunpack.c.1.s8 %v402_v14 }
  0x16   :  { %273 = vst [vmem:[#allocation2 + $0x30] sm:$0xff] %v241_v18  ;;  %v242_v44 = vadd.f32 %v475_v9, %v168_v29  ;;  %v96_v45 = vcvt.s32.f32 %v64_v32  ;;  %v97_v46 = vcvt.s32.f32 %v65_v35  ;;  %v37_v47 = vunpack.c.1.s8 %v407_v15 }
  0x17   :  { %275 = vst [vmem:[#allocation2 + $0x40] sm:$0xff] %v243_v38  ;;  %v98_v48 = vcvt.s32.f32 %v66_v39  ;;  %v99_v49 = vcvt.s32.f32 %v67_v40  ;;  %v68_v51 = vand.u32 255, %v36_v42  ;;  %v38_v52 = vunpack.c.1.s8 %v448_v50 }
  0x18   :  { %274 = vst [vmem:[#allocation2 + $0x38] sm:$0xff] %v242_v44  ;;  %v170_v55 = vmul.f32 %v426_v33, %v96_v45  ;;  %v171_v56 = vmul.f32 %v430_v36, %v97_v46  ;;  %v69_v57 = vand.u32 255, %v37_v47  ;;  %v71_v58 = vand.u32 255, %v39_v7 }
  0x19   :  { %v172_v59 = vmul.f32 %v436_v41, %v98_v48  ;;  %v173_v60 = vmul.f32 %v451_v53, %v99_v49  ;;  %v100_v61 = vcvt.s32.f32 %v68_v51  ;;  %v70_v62 = vand.u32 255, %v38_v52 }
  0x1a   :  { %v244_v2 = vadd.f32 %v428_v34, %v170_v55  ;;  %v245_v10 = vadd.f32 %v432_v37, %v171_v56  ;;  %v101_v11 = vcvt.s32.f32 %v69_v57  ;;  %v103_v19 = vcvt.s32.f32 %v71_v58 }
  0x1b   :  { %v246_v20 = vadd.f32 %v439_v43, %v172_v59  ;;  %v247_v22 = vadd.f32 %v453_v54, %v173_v60  ;;  %v174_v23 = vmul.f32 %v461_v63, %v100_v61  ;;  %v102_v24 = vcvt.s32.f32 %v70_v62 }
  0x1c   :  { %276 = vst [vmem:[#allocation2 + $0x48] sm:$0xff] %v244_v2  ;;  %277 = vst [vmem:[#allocation2 + $0x50] sm:$0xff] %v245_v10  ;;  %v175_v7 = vmul.f32 %v468_v12, %v101_v11  ;;  %v177_v6 = vmul.f32 %v422_v30, %v103_v19  ;;  %v40_v25 = vunpack.c.2.s8 %v374_v3  ;;  %v41_v26 = vunpack.c.2.s8 %v379_v4 }
  0x1d   :  { %278 = vst [vmem:[#allocation2 + $0x58] sm:$0xff] %v246_v20  ;;  %279 = vst [vmem:[#allocation2 + $0x60] sm:$0xff] %v247_v22  ;;  %v248_v27 = vadd.f32 %v463_v1, %v174_v23  ;;  %v176_v28 = vmul.f32 %v473_v21, %v102_v24  ;;  %v42_v17 = vunpack.c.2.s8 %v384_v5  ;;  %v43_v18 = vunpack.c.2.s8 %v397_v13 }
  0x1e   :  { %v249_v29 = vadd.f32 %v470_v16, %v175_v7  ;;  %v251_v32 = vadd.f32 %v424_v31, %v177_v6  ;;  %v72_v35 = vand.u32 255, %v40_v25  ;;  %v73_v38 = vand.u32 255, %v41_v26 }
  0x1f   :  { %280 = vst [vmem:[#allocation2 + $0x68] sm:$0xff] %v248_v27  ;;  %v250_v39 = vadd.f32 %v475_v9, %v176_v28  ;;  %v74_v40 = vand.u32 255, %v42_v17  ;;  %v75_v42 = vand.u32 255, %v43_v18  ;;  %v44_v44 = vunpack.c.2.s8 %v402_v14 }
  0x20   :  { %281 = vst [vmem:[#allocation2 + $0x70] sm:$0xff] %v249_v29  ;;  %283 = vst [vmem:[#allocation2 + $0x80] sm:$0xff] %v251_v32  ;;  %v104_v45 = vcvt.s32.f32 %v72_v35  ;;  %v105_v46 = vcvt.s32.f32 %v73_v38  ;;  %v45_v47 = vunpack.c.2.s8 %v407_v15  ;;  %v46_v48 = vunpack.c.2.s8 %v448_v50 }
  0x21   :  { %282 = vst [vmem:[#allocation2 + $0x78] sm:$0xff] %v250_v39  ;;  %v106_v49 = vcvt.s32.f32 %v74_v40  ;;  %v107_v51 = vcvt.s32.f32 %v75_v42  ;;  %v76_v52 = vand.u32 255, %v44_v44  ;;  %v79_v55 = vand.u32 255, %v47_v8 }
  0x22   :  { %v178_v56 = vmul.f32 %v426_v33, %v104_v45  ;;  %v179_v57 = vmul.f32 %v430_v36, %v105_v46  ;;  %v77_v58 = vand.u32 255, %v45_v47  ;;  %v78_v59 = vand.u32 255, %v46_v48 }
  0x23   :  { %v180_v60 = vmul.f32 %v436_v41, %v106_v49  ;;  %v181_v61 = vmul.f32 %v451_v53, %v107_v51  ;;  %v108_v62 = vcvt.s32.f32 %v76_v52  ;;  %v111_v2 = vcvt.s32.f32 %v79_v55 }
  0x24   :  { %v252_v10 = vadd.f32 %v428_v34, %v178_v56  ;;  %v253_v11 = vadd.f32 %v432_v37, %v179_v57  ;;  %v109_v19 = vcvt.s32.f32 %v77_v58  ;;  %v110_v20 = vcvt.s32.f32 %v78_v59 }
  0x25   :  { %v254_v0 = vadd.f32 %v439_v43, %v180_v60  ;;  %v255_v8 = vadd.f32 %v453_v54, %v181_v61  ;;  %v182_v22 = vmul.f32 %v461_v63, %v108_v62  ;;  %v185_v23 = vmul.f32 %v422_v30, %v111_v2 }
  0x26   :  { %284 = vst [vmem:[#allocation2 + $0x88] sm:$0xff] %v252_v10  ;;  %285 = vst [vmem:[#allocation2 + $0x90] sm:$0xff] %v253_v11  ;;  %v183_v24 = vmul.f32 %v468_v12, %v109_v19  ;;  %v184_v7 = vmul.f32 %v473_v21, %v110_v20  ;;  %v48_v6 = vunpack.c.3.s8 %v374_v3  ;;  %v49_v25 = vunpack.c.3.s8 %v379_v4 }
  0x27   :  { %286 = vst [vmem:[#allocation2 + $0x98] sm:$0xff] %v254_v0  ;;  %287 = vst [vmem:[#allocation2 + $0xa0] sm:$0xff] %v255_v8  ;;  %v256_v26 = vadd.f32 %v463_v1, %v182_v22  ;;  %v259_v27 = vadd.f32 %v424_v31, %v185_v23  ;;  %v50_v28 = vunpack.c.3.s8 %v384_v5  ;;  %v51_v30 = vunpack.c.3.s8 %v397_v13 }
  0x28   :  { %v257_v17 = vadd.f32 %v470_v16, %v183_v24  ;;  %v258_v18 = vadd.f32 %v475_v9, %v184_v7  ;;  %v80_v29 = vand.u32 255, %v48_v6  ;;  %v81_v32 = vand.u32 255, %v49_v25 }
  0x29   :  { %288 = vst [vmem:[#allocation2 + $0xa8] sm:$0xff] %v256_v26  ;;  %291 = vst [vmem:[#allocation2 + $0xc0] sm:$0xff] %v259_v27  ;;  %v82_v3 = vand.u32 255, %v50_v28  ;;  %v83_v4 = vand.u32 255, %v51_v30  ;;  %v52_v35 = vunpack.c.3.s8 %v402_v14  ;;  %v53_v38 = vunpack.c.3.s8 %v407_v15 }
  0x2a   :  { %289 = vst [vmem:[#allocation2 + $0xb0] sm:$0xff] %v257_v17  ;;  %290 = vst [vmem:[#allocation2 + $0xb8] sm:$0xff] %v258_v18  ;;  %v112_v31 = vcvt.s32.f32 %v80_v29  ;;  %v113_v5 = vcvt.s32.f32 %v81_v32  ;;  %v54_v13 = vunpack.c.3.s8 %v448_v50 }
  0x2b   :  { %v114_v39 = vcvt.s32.f32 %v82_v3  ;;  %v115_v40 = vcvt.s32.f32 %v83_v4  ;;  %v84_v42 = vand.u32 255, %v52_v35  ;;  %v85_v44 = vand.u32 255, %v53_v38 }
  0x2c   :  { %v186_v45 = vmul.f32 %v426_v33, %v112_v31  ;;  %v187_v46 = vmul.f32 %v430_v36, %v113_v5  ;;  %v86_v47 = vand.u32 255, %v54_v13 }
  0x2d   :  { %v188_v48 = vmul.f32 %v436_v41, %v114_v39  ;;  %v189_v14 = vmul.f32 %v451_v53, %v115_v40  ;;  %v116_v15 = vcvt.s32.f32 %v84_v42  ;;  %v117_v49 = vcvt.s32.f32 %v85_v44 }
  0x2e   :  { %v260_v51 = vadd.f32 %v428_v34, %v186_v45  ;;  %v261_v52 = vadd.f32 %v432_v37, %v187_v46  ;;  %v118_v50 = vcvt.s32.f32 %v86_v47 }
  0x2f   :  { %v262_v55 = vadd.f32 %v439_v43, %v188_v48  ;;  %v263_v56 = vadd.f32 %v453_v54, %v189_v14  ;;  %v190_v33 = vmul.f32 %v461_v63, %v116_v15  ;;  %v191_v36 = vmul.f32 %v468_v12, %v117_v49 }
  0x30   :  { %292 = vst [vmem:[#allocation2 + $0xc8] sm:$0xff] %v260_v51  ;;  %293 = vst [vmem:[#allocation2 + $0xd0] sm:$0xff] %v261_v52  ;;  %v192_v41 = vmul.f32 %v473_v21, %v118_v50 }
  0x31   :  { %294 = vst [vmem:[#allocation2 + $0xd8] sm:$0xff] %v262_v55  ;;  %295 = vst [vmem:[#allocation2 + $0xe0] sm:$0xff] %v263_v56  ;;  %v264_v34 = vadd.f32 %v463_v1, %v190_v33  ;;  %v265_v37 = vadd.f32 %v470_v16, %v191_v36 }
  0x32   :  { %v266_v43 = vadd.f32 %v475_v9, %v192_v41 }
  0x33   :  { %296 = vst [vmem:[#allocation2 + $0xe8] sm:$0xff] %v264_v34  ;;  %297 = vst [vmem:[#allocation2 + $0xf0] sm:$0xff] %v265_v37 }
  0x34   :  { %298 = vst [vmem:[#allocation2 + $0xf8] sm:$0xff] %v266_v43 }
  0x35   :  { %329 = shalt.err (!%p326_p4)
}
  0x36   :  { %s330_s7 = scalar_lea.hbm %s570_s3, 4096 }
  0x37   :  { %p331_p5 = scmp.ne.s32.totalorder %s570_s3, %s330_s7  ;;  %p334_p6 = scmp.lt.u32.totalorder %s330_s7, %s570_s3 }
  0x39   :  { %p336_p7 = pnand %p334_p6, %p331_p5 }
  0x3b   :  { %339 = shalt.err (!%p336_p7)
}
  0x3c   :  { %s343_s12 = smov 1024   ;;  %s344_s13 = smov 64  }
  0x3d   :  { %310 = dma.vmem_to_hbm [thread:$0]  %s305_s30, 4096, %s570_s3, [#allocation3], %s343_s12, %s343_s12, %s344_s13  }
  0x3e   :  { %340 = dma.done.wait [#allocation3], 4096  }
  0x3f   :  { %341 = vsyncadd [#allocation3], 4294963200 }
  0x40   :  { %314 = vsyncpa [#allocation3], 1 }

</bundles_post_ra>
